<compile_context>
chip_gen: v5e
topology: v5e:2x2
jax: 0.10.0
libtpu: 0.0.40
codegen_flags: <defaults>
</compile_context>

<pallas_src>
import functools

import numpy as np
import jax
import jax.numpy as jnp
from jax.experimental import pallas as pl
from jax.experimental.pallas import tpu as pltpu


def _round_up(a: int, b: int) -> int:
    return ((a + b - 1) // b) * b


def _vmem_capacity_bytes() -> int:
    try:
        return int(pltpu.get_tpu_info().vmem_capacity_bytes)
    except Exception:
        return 128 * 1024 * 1024   # assume v5e/v6e-class VMEM if query fails


def _weight_spec(shape, index_map, nbuf):
    # Triple-buffer weight chunks only where VMEM allows (smooths DMA jitter);
    # fall back silently if this Pallas version lacks pipeline_mode/Buffered.
    if nbuf > 2:
        try:
            return pl.BlockSpec(shape, index_map, pipeline_mode=pl.Buffered(nbuf))
        except Exception:
            pass
    return pl.BlockSpec(shape, index_map)


def _ffn_kernel(x_ref, w1_ref, b1_ref, w2_ref, b2_ref, o_ref, acc_ref, *, tff):
    # x_ref : (tm, d_model_p)    token tile
    # w1_ref: (d_model_p, tff)   fc1 weight chunk (cols k*tff : (k+1)*tff)
    # b1_ref: (1, d_ff_p)        fc1 bias, fully resident (sliced per k)
    # w2_ref: (tff, d_model_p)   fc2 weight chunk (rows k*tff : (k+1)*tff)
    # b2_ref: (1, d_model_p)     fc2 bias (full, constant across grid)
    # o_ref : (tm, d_model_p)    output tile (same block across the k axis)
    # acc_ref:(tm, d_model_p)    f32 accumulator scratch
    k = pl.program_id(1)
    x = x_ref[...]

    # fc1 chunk on the MXU with f32 accumulation; bias + ReLU + downcast fused
    # so the (tm, tff) intermediate is written once, in the compute dtype.
    b1_chunk = b1_ref[:, pl.ds(pl.multiple_of(k * tff, 128), tff)]
    h = jnp.dot(x, w1_ref[...], preferred_element_type=jnp.float32)
    h = jnp.maximum(h + b1_chunk.astype(jnp.float32), 0.0).astype(x.dtype)

    # dropout: identity (inference mode).

    # fc2 chunk: partial product along the d_ff reduction axis.
    contrib = jnp.dot(h, w2_ref[...], preferred_element_type=jnp.float32)

    @pl.when(k == 0)
    def _():
        acc_ref[...] = contrib          # first step assigns (no zero-fill pass)

    @pl.when(k > 0)
    def _():
        acc_ref[...] += contrib

    @pl.when(k == pl.num_programs(1) - 1)
    def _():
        o_ref[...] = (acc_ref[...] + b2_ref[...].astype(jnp.float32)
                      ).astype(o_ref.dtype)


def feed_forward_block(x, w1, b1, w2, b2, *, tm=None, tff=None,
                       compute_dtype=None, vmem_limit_bytes=None):
    """x: (B, S, d_model); w1: (d_model, d_ff); b1: (d_ff,);
       w2: (d_ff, d_model); b2: (d_model,). Returns (B, S, d_model)."""
    B, S, d_model = x.shape
    d_ff = w1.shape[1]
    M = B * S
    out_dtype = x.dtype
    o_item = np.dtype(out_dtype).itemsize
    b_item = np.dtype(b1.dtype).itemsize

    cdt = np.dtype(compute_dtype) if compute_dtype is not None else np.dtype(x.dtype)
    c_item = cdt.itemsize
    is_bf16c = cdt == jnp.bfloat16
    row_g = 16 if is_bf16c else 8            # sublane packing granularity

    # ---- generation-aware VMEM budget ----
    cap = _vmem_capacity_bytes()
    small_vmem = cap < 100 * (1 << 20)       # v7x: 64 MiB per TensorCore
    if small_vmem:
        vmem_budget = 44 * (1 << 20)
        default_limit = 52 * (1 << 20)
    else:                                    # v5e / v6e: 128 MiB
        vmem_budget = 88 * (1 << 20)
        default_limit = 100 * (1 << 20)
    if vmem_limit_bytes is None:
        vmem_limit_bytes = default_limit

    d_model_p = _round_up(d_model, 128)

    # ---- tile defaults: dtype- and generation-aware (flops per weight byte) --
    if tm is None:
        tm = 512 if small_vmem else (1024 if is_bf16c else 512)
    if tff is None:
        tff = 512 if small_vmem else (1024 if is_bf16c else 512)
    tm = max(row_g, min(_round_up(tm, row_g), _round_up(M, row_g)))
    tff = max(128, min(_round_up(tff, 128), _round_up(d_ff, 128)))

    # ---- megacore: give the 'parallel' token axis at least 2 steps ----
    if (M + tm - 1) // tm < 2 and M > row_g:
        tm = min(tm, _round_up((M + 1) // 2, row_g))

    # ---- shrink tiles until the pipelined footprint fits the VMEM budget ----
    def footprint(tm_, tff_, nbuf_w):
        d_ff_p_ = _round_up(d_ff, tff_)
        return (2 * tm_ * d_model_p * c_item          # x tile (double-buffered)
                + 2 * tm_ * d_model_p * o_item        # out tile
                + nbuf_w * d_model_p * tff_ * c_item  # W1 chunk
                + nbuf_w * tff_ * d_model_p * c_item  # W2 chunk
                + 2 * d_ff_p_ * b_item                # b1 (resident)
                + 2 * d_model_p * b_item              # b2 (resident)
                + tm_ * d_model_p * 4                 # f32 accumulator scratch
                + tm_ * tff_ * (4 + c_item))          # h temp (f32 + downcast)

    while footprint(tm, tff, 2) > vmem_budget and tff > 128:
        tff = max(128, _round_up(tff // 2, 128))
    while footprint(tm, tff, 2) > vmem_budget and tm > row_g:
        tm = max(row_g, _round_up(tm // 2, row_g))

    # ---- padded sizes so the grid divides evenly & lanes are dense ----
    Mp = _round_up(M, tm)
    d_ff_p = _round_up(d_ff, tff)
    k_steps = d_ff_p // tff

    nbuf_w = 3 if (not small_vmem and k_steps >= 3
                   and footprint(tm, tff, 3) <= vmem_budget) else 2

    x2 = x.reshape(M, d_model)
    w1p, w2p = w1, w2
    if compute_dtype is not None and cdt != np.dtype(x.dtype):
        x2 = x2.astype(cdt)
        w1p = w1p.astype(cdt)
        w2p = w2p.astype(cdt)
    if (Mp, d_model_p) != (M, d_model):
        x2 = jnp.pad(x2, ((0, Mp - M), (0, d_model_p - d_model)))
    if (d_model_p, d_ff_p) != (d_model, d_ff):
        w1p = jnp.pad(w1p, ((0, d_model_p - d_model), (0, d_ff_p - d_ff)))
    if (d_ff_p, d_model_p) != (d_ff, d_model):
        w2p = jnp.pad(w2p, ((0, d_ff_p - d_ff), (0, d_model_p - d_model)))
    b1p = jnp.pad(b1, (0, d_ff_p - d_ff)).reshape(1, d_ff_p)
    b2p = jnp.pad(b2, (0, d_model_p - d_model)).reshape(1, d_model_p)

    grid = (Mp // tm, k_steps)   # tokens (parallel), d_ff chunks (reduction)

    # Accurate traffic estimate: x + out once, weights re-streamed per token tile.
    cost = pl.CostEstimate(
        flops=4 * Mp * d_model_p * d_ff_p,
        transcendentals=0,
        bytes_accessed=(Mp * d_model_p * c_item
                        + Mp * d_model_p * o_item
                        + grid[0] * 2 * d_model_p * d_ff_p * c_item
                        + (d_ff_p + d_model_p) * b_item),
    )

    kernel = functools.partial(_ffn_kernel, tff=tff)

    out2 = pl.pallas_call(
        kernel,
        out_shape=jax.ShapeDtypeStruct((Mp, d_model_p), out_dtype),
        grid_spec=pltpu.PrefetchScalarGridSpec(
            num_scalar_prefetch=0,
            grid=grid,
            in_specs=[
                pl.BlockSpec((tm, d_model_p), lambda i, k: (i, 0)),        # x tile
                _weight_spec((d_model_p, tff), lambda i, k: (0, k), nbuf_w),  # W1
                pl.BlockSpec((1, d_ff_p), lambda i, k: (0, 0)),            # b1 full
                _weight_spec((tff, d_model_p), lambda i, k: (k, 0), nbuf_w),  # W2
                pl.BlockSpec((1, d_model_p), lambda i, k: (0, 0)),         # b2 full
            ],
            out_specs=pl.BlockSpec((tm, d_model_p), lambda i, k: (i, 0)),
            scratch_shapes=[pltpu.VMEM((tm, d_model_p), jnp.float32)],
        ),
        compiler_params=pltpu.CompilerParams(
            dimension_semantics=("parallel", "arbitrary"),
            vmem_limit_bytes=vmem_limit_bytes,
        ),
        cost_estimate=cost,
    )(x2, w1p, b1p, w2p, b2p)

    return out2[:M, :d_model].reshape(B, S, d_model)


def _init_params(key, d_model, d_ff, dtype=jnp.float32):
    # Deterministic init mimicking nn.Linear's uniform(-1/sqrt(fan_in), ...).
    k1, k2, k3, k4 = jax.random.split(key, 4)
    lim1 = 1.0 / (d_model ** 0.5)
    lim2 = 1.0 / (d_ff ** 0.5)
    # Stored pre-transposed: (in_features, out_features)
    w1 = jax.random.uniform(k1, (d_model, d_ff), dtype, -lim1, lim1)
    b1 = jax.random.uniform(k2, (d_ff,), dtype, -lim1, lim1)
    w2 = jax.random.uniform(k3, (d_ff, d_model), dtype, -lim2, lim2)
    b2 = jax.random.uniform(k4, (d_model,), dtype, -lim2, lim2)
    return w1, b1, w2, b2


def _reference(x, w1, b1, w2, b2):
    B, S, d_model = x.shape
    h = jnp.maximum(x.reshape(-1, d_model) @ w1 + b1, 0.0)
    return (h @ w2 + b2).reshape(B, S, d_model)


if __name__ == "__main__":
    key = jax.random.PRNGKey(0)

    # ---- test 1: tiny "module-like" shapes (exercises padding paths) ----
    batch, seq, d_model, d_ff = 2, 8, 32, 64
    kx, kp, key = jax.random.split(key, 3)
    x = jax.random.normal(kx, (batch, seq, d_model), jnp.float32)
    w1, b1, w2, b2 = _init_params(kp, d_model, d_ff)
    out = jax.block_until_ready(feed_forward_block(x, w1, b1, w2, b2))
    ref = _reference(x, w1, b1, w2, b2)
    assert out.shape == (batch, seq, d_model)
    assert jnp.allclose(out, ref, atol=2e-2, rtol=2e-2)

    # ---- test 2: shapes that exercise the tiled, multi-step grid ----
    batch, seq, d_model, d_ff = 2, 256, 128, 1024
    kx, kp = jax.random.split(key)
    x = jax.random.normal(kx, (batch, seq, d_model), jnp.float32)
    w1, b1, w2, b2 = _init_params(kp, d_model, d_ff)
    out = jax.block_until_ready(feed_forward_block(x, w1, b1, w2, b2))
    ref = _reference(x, w1, b1, w2, b2)
    assert out.shape == (batch, seq, d_model)
    assert jnp.allclose(out, ref, atol=2e-2, rtol=2e-2)

    # ---- test 3: opt-in bf16 compute path on f32 inputs (f32 accumulation) ----
    out_bf = jax.block_until_ready(
        feed_forward_block(x, w1, b1, w2, b2, compute_dtype=jnp.bfloat16))
    assert out_bf.shape == (batch, seq, d_model)
    assert bool(jnp.all(jnp.isfinite(out_bf)))
    assert jnp.allclose(out_bf, ref, atol=2e-1, rtol=2e-1)   # loose: bf16 products

    print("KERNEL_OK")
</pallas_src>

<mosaic_0001>
module attributes {stable_mosaic.version = 11 : i64} {
  func.func @_ffn_kernel(%arg0: i32, %arg1: i32, %arg2: memref<8x128xf32, #tpu.memory_space<vmem>>, %arg3: memref<128x128xf32, #tpu.memory_space<vmem>>, %arg4: memref<1x128xf32, #tpu.memory_space<vmem>>, %arg5: memref<128x128xf32, #tpu.memory_space<vmem>>, %arg6: memref<1x128xf32, #tpu.memory_space<vmem>>, %arg7: memref<8x128xf32, #tpu.memory_space<vmem>>, %arg8: memref<8x128xf32, #tpu.memory_space<vmem>>) attributes {dimension_semantics = [#tpu.dimension_semantics<parallel>, #tpu.dimension_semantics<arbitrary>], iteration_bounds = array<i64: 2, 1>, scalar_prefetch = 0 : i64, scratch_operands = 1 : i64, tpu.core_type = #tpu.core_type<tc>, window_params = [{transform_indices = @transform_0, window_bounds = array<i64: 8, 128>}, {transform_indices = @transform_1, window_bounds = array<i64: 128, 128>}, {pipeline_mode = #tpu.pipeline_mode<synchronous>, transform_indices = @transform_2, window_bounds = array<i64: 1, 128>}, {transform_indices = @transform_3, window_bounds = array<i64: 128, 128>}, {pipeline_mode = #tpu.pipeline_mode<synchronous>, transform_indices = @transform_4, window_bounds = array<i64: 1, 128>}, {transform_indices = @transform_5, window_bounds = array<i64: 8, 128>}]} {
    %c0 = arith.constant 0 : index
    %c0_0 = arith.constant 0 : index
    %0 = vector.load %arg2[%c0, %c0_0] : memref<8x128xf32, #tpu.memory_space<vmem>>, vector<8x128xf32>
    %c128_i32 = arith.constant 128 : i32
    %1 = arith.muli %arg1, %c128_i32 : i32
    %2 = tpu.assume_multiple %1, 128 : i32
    %c0_1 = arith.constant 0 : index
    %3 = arith.index_cast %2 : i32 to index
    %4 = vector.load %arg4[%c0_1, %3] : memref<1x128xf32, #tpu.memory_space<vmem>>, vector<1x128xf32>
    %c0_2 = arith.constant 0 : index
    %c0_3 = arith.constant 0 : index
    %5 = vector.load %arg3[%c0_2, %c0_3] : memref<128x128xf32, #tpu.memory_space<vmem>>, vector<128x128xf32>
    %cst = arith.constant dense<0.000000e+00> : vector<8x128xf32>
    %6 = tpu.matmul %0, %5, %cst {dimension_numbers = #tpu.dot_dimension_numbers<[1], [0], [0], [1], [0, 0, 1, 1], [], []>} : vector<8x128xf32>, vector<128x128xf32>, vector<8x128xf32> -> vector<8x128xf32>
    %7 = vector.broadcast %4 : vector<1x128xf32> to vector<8x128xf32>
    %8 = arith.addf %6, %7 : vector<8x128xf32>
    %cst_4 = arith.constant 0.000000e+00 : f32
    %9 = vector.broadcast %cst_4 : f32 to vector<8x128xf32>
    %10 = arith.maximumf %8, %9 : vector<8x128xf32>
    %c0_5 = arith.constant 0 : index
    %c0_6 = arith.constant 0 : index
    %11 = vector.load %arg5[%c0_5, %c0_6] : memref<128x128xf32, #tpu.memory_space<vmem>>, vector<128x128xf32>
    %cst_7 = arith.constant dense<0.000000e+00> : vector<8x128xf32>
    %12 = tpu.matmul %10, %11, %cst_7 {dimension_numbers = #tpu.dot_dimension_numbers<[1], [0], [0], [1], [0, 0, 1, 1], [], []>} : vector<8x128xf32>, vector<128x128xf32>, vector<8x128xf32> -> vector<8x128xf32>
    %c0_i32 = arith.constant 0 : i32
    %13 = arith.cmpi eq, %arg1, %c0_i32 : i32
    %14 = arith.extui %13 : i1 to i32
    %c0_i32_8 = arith.constant 0 : i32
    %15 = arith.cmpi ne, %14, %c0_i32_8 : i32
    scf.if %15 {
      %c0_13 = arith.constant 0 : index
      %c0_14 = arith.constant 0 : index
      %22 = vector.load %arg8[%c0_13, %c0_14] : memref<8x128xf32, #tpu.memory_space<vmem>>, vector<8x128xf32>
      tpu.vector_store %arg8[%c0_13, %c0_14], %12 {strides = array<i32>} : memref<8x128xf32, #tpu.memory_space<vmem>>, vector<8x128xf32>,
    } else {
    }
    %c0_i32_9 = arith.constant 0 : i32
    %16 = arith.cmpi sgt, %arg1, %c0_i32_9 : i32
    %17 = arith.extui %16 : i1 to i32
    %c0_i32_10 = arith.constant 0 : i32
    %18 = arith.cmpi ne, %17, %c0_i32_10 : i32
    scf.if %18 {
      %c0_13 = arith.constant 0 : index
      %c0_14 = arith.constant 0 : index
      %22 = vector.load %arg8[%c0_13, %c0_14] : memref<8x128xf32, #tpu.memory_space<vmem>>, vector<8x128xf32>
      %23 = arith.addf %22, %12 : vector<8x128xf32>
      %c0_15 = arith.constant 0 : index
      %c0_16 = arith.constant 0 : index
      %24 = vector.load %arg8[%c0_15, %c0_16] : memref<8x128xf32, #tpu.memory_space<vmem>>, vector<8x128xf32>
      tpu.vector_store %arg8[%c0_15, %c0_16], %23 {strides = array<i32>} : memref<8x128xf32, #tpu.memory_space<vmem>>, vector<8x128xf32>,
    } else {
    }
    %c0_i32_11 = arith.constant 0 : i32
    %19 = arith.cmpi eq, %arg1, %c0_i32_11 : i32
    %20 = arith.extui %19 : i1 to i32
    %c0_i32_12 = arith.constant 0 : i32
    %21 = arith.cmpi ne, %20, %c0_i32_12 : i32
    scf.if %21 {
      %c0_13 = arith.constant 0 : index
      %c0_14 = arith.constant 0 : index
      %22 = vector.load %arg8[%c0_13, %c0_14] : memref<8x128xf32, #tpu.memory_space<vmem>>, vector<8x128xf32>
      %c0_15 = arith.constant 0 : index
      %c0_16 = arith.constant 0 : index
      %23 = vector.load %arg6[%c0_15, %c0_16] : memref<1x128xf32, #tpu.memory_space<vmem>>, vector<1x128xf32>
      %24 = vector.broadcast %23 : vector<1x128xf32> to vector<8x128xf32>
      %25 = arith.addf %22, %24 : vector<8x128xf32>
      %c0_17 = arith.constant 0 : index
      %c0_18 = arith.constant 0 : index
      %26 = vector.load %arg7[%c0_17, %c0_18] : memref<8x128xf32, #tpu.memory_space<vmem>>, vector<8x128xf32>
      tpu.vector_store %arg7[%c0_17, %c0_18], %25 {strides = array<i32>} : memref<8x128xf32, #tpu.memory_space<vmem>>, vector<8x128xf32>,
    } else {
    }
    return
  }
  func.func @transform_0(%arg0: i32, %arg1: i32) -> (i32, i32) {
    %c0_i32 = arith.constant 0 : i32
    %c0_i32_0 = arith.constant 0 : i32
    return %arg0, %c0_i32 : i32, i32
  }
  func.func @transform_1(%arg0: i32, %arg1: i32) -> (i32, i32) {
    %c0_i32 = arith.constant 0 : i32
    %c0_i32_0 = arith.constant 0 : i32
    return %c0_i32, %arg1 : i32, i32
  }
  func.func @transform_2(%arg0: i32, %arg1: i32) -> (i32, i32) {
    %c0_i32 = arith.constant 0 : i32
    %c0_i32_0 = arith.constant 0 : i32
    %c0_i32_1 = arith.constant 0 : i32
    return %c0_i32, %c0_i32_0 : i32, i32
  }
  func.func @transform_3(%arg0: i32, %arg1: i32) -> (i32, i32) {
    %c0_i32 = arith.constant 0 : i32
    %c0_i32_0 = arith.constant 0 : i32
    return %arg1, %c0_i32 : i32, i32
  }
  func.func @transform_4(%arg0: i32, %arg1: i32) -> (i32, i32) {
    %c0_i32 = arith.constant 0 : i32
    %c0_i32_0 = arith.constant 0 : i32
    %c0_i32_1 = arith.constant 0 : i32
    return %c0_i32, %c0_i32_0 : i32, i32
  }
  func.func @transform_5(%arg0: i32, %arg1: i32) -> (i32, i32) {
    %c0_i32 = arith.constant 0 : i32
    %c0_i32_0 = arith.constant 0 : i32
    return %arg0, %c0_i32 : i32, i32
  }
}

</mosaic_0001>

<bundles_post_ra>
// kernel: tpu_custom_call.1
= control target key start
LH: loop header
LB: loop body
LE: loop exit
PB: predicated region body
PF: predicated region fallthrough
CT: control target
= control target key end

     0   :  { %10 = vsyncpa [#allocation4], 0  ;;  %s998_s0 = inlined_call_operand.hbm [shape: f32[16,128], index: 0, kind: input, shape index: {}]   ;;  %s999_s1 = inlined_call_operand.hbm [shape: f32[128,128], index: 1, kind: input, shape index: {}]   ;;  %s1000_s2 = inlined_call_operand.vmem [shape: f32[1,128], index: 2, kind: input, shape index: {}]   ;;  %s1001_s3 = inlined_call_operand.hbm [shape: f32[128,128], index: 3, kind: input, shape index: {}]   ;;  %s1002_s4 = inlined_call_operand.vmem [shape: f32[1,128], index: 4, kind: input, shape index: {}]   ;;  %s1003_s5 = inlined_call_operand.hbm [shape: f32[16,128], index: 5, kind: output, shape index: {}]  }
   0x1   :  { %12 = vsyncpa [#allocation4 + $0x1], 0 }
   0x2   :  { %13 = vsyncpa [#allocation7], 0 }
   0x3   :  { %14 = vsyncpa [#allocation5], 0 }
   0x4   :  { %16 = vsyncpa [#allocation5 + $0x1], 0  ;;  %s841_s18 = smov 0   ;;  %s843_s19 = smov 0  }
   0x5   :  { %s845_s20 = smov 0   ;;  %s847_s21 = smov 0  }
   0x6   :  { %s849_s22 = smov 0   ;;  %s851_s23 = smov 0  }
   0x7 LB: > { %s525_s24 = sadd.s32 4294967295, %s805_s23   ;;  %p527_p0 = scmp.ge.s32.totalorder %s805_s23, 1  ;;  %s805_s23 = sphi %s851_s23, %s22_s23   ;;  %s801_s22 = sphi %s849_s22, %s1013_s22   ;;  %s797_s21 = sphi %s847_s21, %s1012_s21   ;;  %s793_s20 = sphi %s845_s20, %s1011_s20   ;;  %s789_s19 = sphi %s843_s19, %s1010_s19   ;;  %s785_s18 = sphi %s841_s18, %s1009_s18  }
   0x8   : > { %p875_p1 = scmp.eq.s32.totalorder %s525_s24, 0  ;;  %p185_p2 = scmp.lt.s32.totalorder %s805_s23, 3 }
   0x9   : > { %s198_s28 = sshll.u32 %s999_s1, 4  ;;  %s807_s30 = smov [#allocation6]   ;;  %s199_s28 = int_to_ptr.hbm [resolvable:$true] %s198_s28 }
   0xa   : > { %p883_p3 = pnand %p527_p0, %p185_p2  ;;  %s200_s6 = sshll.u32 %s807_s30, 4  ;;  %s201_s6 = int_to_ptr.vmem [resolvable:$true] %s200_s6 }
   0xb   : > { %p530_p6 = scmp.ge.s32.totalorder %s805_s23, 2  ;;  %s218_s9 = sshll.u32 %s1001_s3, 4  ;;  %s219_s9 = int_to_ptr.hbm [resolvable:$true] %s218_s9 }
   0xc   : > { %p554_p4 = pneg %p883_p3  ;;  %s808_s10 = smov 128  }
   0xd   : > { %s809_s11 = smov 8   ;;  %s810_s12 = smov [#allocation8]  }
   0xe   : > { %p555_p5 = pnand %p554_p4, %p875_p1  ;;  %s220_s13 = sshll.u32 %s810_s12, 4  ;;  %s221_s13 = int_to_ptr.vmem [resolvable:$true] %s220_s13 }
   0xf   : > { %s34_s14 = sadd.s32 1, %s801_s22  ;;  %s526_s15 = sadd.s32 4294967294, %s805_s23  }
  0x10   : > { %557 = dma.hbm_to_vmem [thread:$0]  (!%p555_p5), %s199_s28, 2048, %s201_s6, [#allocation7], %s808_s10, %s808_s10, %s809_s11  }
  0x11   : > { %560 = dma.hbm_to_vmem [thread:$0]  (!%p555_p5), %s219_s9, 2048, %s221_s13, [#allocation7], %s808_s10, %s808_s10, %s809_s11  }
  0x12   : > { %p36_p7 = scmp.ge.s32.totalorder %s34_s14, 2  ;;  %s41_s16 = sadd.s32 1, %s793_s20 }
  0x13   : > { %p48_p8 = scmp.ne.s32.totalorder %s793_s20, %s789_s19  ;;  %p49_p9 = scmp.eq.s32.totalorder %s805_s23, 0 }
  0x14   : > { %s1015_s14 = smov (%p36_p7, %s34_s14), 0  ;;  %p54_p10 = scmp.ne.s32.totalorder %s789_s19, %s785_s18 }
  0x15   : > { %s38_s17 = ssub.s32 %s801_s22, %s1015_s14  ;;  %p172_p11 = scmp.eq.s32.totalorder %s525_s24, 1 }
  0x16   : > { %p39_p12 = scmp.eq.s32.totalorder %s38_s17, 0  ;;  %p911_p13 = por %p875_p1, %p54_p10 }
  0x17   : > { %p915_p0 = por %p172_p11, %p48_p8  ;;  %p178_p2 = scmp.eq.s32.totalorder %s526_s15, 1 }
  0x18   : > { %s920_s28 = scalar_select %p39_p12, %s793_s20, %s41_s16  }
  0x19   : > { %p50_p4 = por %p49_p9, %p48_p8  ;;  %p922_p5 = por %p178_p2, %p54_p10 }
  0x1a   : > { %s237_s6 = sand.u32 1, %s793_s20   ;;  %s532_s24 = sshll.u32 %s801_s22, 3 }
  0x1b   : > { %p571_p7 = scmp.lt.s32.totalorder %s805_s23, 2  ;;  %s531_s7 = sshll.u32 %s237_s6, 3 }
  0x1c   : > { %s245_s10 = scalar_lea.hbm %s998_s0, %s532_s24  ;;  %s241_s12 = scalar_lea.vmem [#allocation3], %s531_s7 }
  0x1d   : > { %s247_s11 = sshll.u32 %s245_s10, 4  ;;  %s249_s13 = sshll.u32 %s241_s12, 4  ;;  %s248_s11 = int_to_ptr.hbm [resolvable:$true] %s247_s11  ;;  %s250_s13 = int_to_ptr.vmem [resolvable:$true] %s249_s13 }
  0x1e   : > { %p562_p11 = pnand %p571_p7, %p50_p4  ;;  %s238_s15 = scalar_lea.sflag [#allocation4], %s237_s6 }
  0x1f   : > { %258 = sbr.rel (%p883_p3) target bundleno = 332 (0x14c), region = 40  ;;  %s935_s16 = sand.u32 (!%p883_p3), 1, %s789_s19  }
  0x20   : > { %564 = dma.hbm_to_vmem [thread:$0]  (!%p562_p11), %s248_s11, 128, %s250_s13, %s238_s15  }
  0x21   : > { %s534_s17 = sshll.u32 (!%p883_p3), %s935_s16, 3  ;;  %s261_s24 = scalar_lea.sflag (!%p883_p3), [#allocation4], %s935_s16 }
  0x22   : > { %s941_s7 = scalar_lea.vmem (!%p883_p3), [#allocation3], %s534_s17 }
  0x24   : > { %772 = dma.done.wait (%p911_p13), %s261_s24, 128  }
  0x25   : > { %774 = vsyncadd (%p911_p13), %s261_s24, 4294967168 }
  0x26   : > { %776 = dma.done.wait (%p875_p1), [#allocation7], 4096  }
  0x27   : > { %778 = vsyncadd (%p875_p1), [#allocation7], 4294963200  ;;  %v324_v0 = vld [vmem:[#allocation6 + $0x78] sm:$0xff]  ;;  %v323_v1 = vld [vmem:[#allocation6 + $0x70] sm:$0xff]  ;;  %s539_s26 = sshll.u32 %s797_s21, 3  ;;  %s301_s12 = scalar_lea.vmem [#allocation9], %s534_s17 }
  0x28   : > { %328 = vmatpush.msra.mxu0 %v324_v0  ;;  %v322_v2 = vld [vmem:[#allocation6 + $0x68] sm:$0xff]  ;;  %v321_v3 = vld [vmem:[#allocation6 + $0x60] sm:$0xff]  ;;  %v364_v4 = vld [vmem:[#allocation8 + $0x78] sm:$0xff]  ;;  %s418_s9 = scalar_lea.hbm %s1003_s5, %s539_s26  ;;  %s420_s13 = sshll.u32 %s301_s12, 4  ;;  %s421_s13 = int_to_ptr.vmem [resolvable:$true] %s420_s13 }
  0x29   : > { %v320_v5 = vld [vmem:[#allocation6 + $0x58] sm:$0xff]  ;;  %365 = vmatpush.msra.mxu1 %v364_v4  ;;  %v363_v6 = vld [vmem:[#allocation8 + $0x70] sm:$0xff]  ;;  %v362_v7 = vld [vmem:[#allocation8 + $0x68] sm:$0xff]  ;;  %s422_s15 = sshll.u32 %s418_s9, 4  ;;  %s408_s24 = scalar_lea.sflag [#allocation5], %s935_s16  ;;  %s423_s15 = int_to_ptr.hbm [resolvable:$true] %s422_s15 }
  0x2a   : > { %329 = vmatpush.msra.mxu0 %v323_v1  ;;  %v319_v8 = vld [vmem:[#allocation6 + $0x50] sm:$0xff]  ;;  %v361_v9 = vld [vmem:[#allocation8 + $0x60] sm:$0xff]  ;;  %v318_v10 = vld [vmem:[#allocation6 + $0x48] sm:$0xff]  ;;  %s733_s21 = sshra.s32 %s423_s15, 4  ;;  %s739_s26 = scalar_lea.hbm %s1003_s5, 16  ;;  %s734_s21 = int_to_ptr.hbm [resolvable:$true] %s733_s21 }
  0x2b   : > { %366 = vmatpush.msra.mxu1 %v363_v6  ;;  %v360_v11 = vld [vmem:[#allocation8 + $0x58] sm:$0xff]  ;;  %v317_v12 = vld [vmem:[#allocation6 + $0x40] sm:$0xff]  ;;  %v359_v13 = vld [vmem:[#allocation8 + $0x50] sm:$0xff]  ;;  %p740_p9 = scmp.lt.s32.totalorder %s734_s21, %s1003_s5 }
  0x2c   : > { %330 = vmatpush.msra.mxu0 %v322_v2  ;;  %v316_v14 = vld [vmem:[#allocation6 + $0x38] sm:$0xff]  ;;  %v358_v15 = vld [vmem:[#allocation8 + $0x48] sm:$0xff]  ;;  %v315_v16 = vld [vmem:[#allocation6 + $0x30] sm:$0xff] }
  0x2d   : > { %367 = vmatpush.msra.mxu1 %v362_v7  ;;  %v357_v17 = vld [vmem:[#allocation8 + $0x40] sm:$0xff]  ;;  %v314_v18 = vld [vmem:[#allocation6 + $0x28] sm:$0xff]  ;;  %v356_v19 = vld [vmem:[#allocation8 + $0x38] sm:$0xff] }
  0x2e   : > { %331 = vmatpush.msra.mxu0 %v321_v3  ;;  %v313_v20 = vld [vmem:[#allocation6 + $0x20] sm:$0xff]  ;;  %v355_v21 = vld [vmem:[#allocation8 + $0x30] sm:$0xff]  ;;  %v312_v22 = vld [vmem:[#allocation6 + $0x18] sm:$0xff] }
  0x2f   : > { %368 = vmatpush.msra.mxu1 %v361_v9  ;;  %v354_v23 = vld [vmem:[#allocation8 + $0x28] sm:$0xff]  ;;  %v311_v24 = vld [vmem:[#allocation6 + $0x10] sm:$0xff]  ;;  %v353_v25 = vld [vmem:[#allocation8 + $0x20] sm:$0xff] }
  0x30   : > { %332 = vmatpush.msra.mxu0 %v320_v5  ;;  %v310_v26 = vld [vmem:[#allocation6 + $0x8] sm:$0xff]  ;;  %v352_v27 = vld [vmem:[#allocation8 + $0x18] sm:$0xff]  ;;  %v309_v28 = vld [vmem:[#allocation6] sm:$0xff] }
  0x31   : > { %369 = vmatpush.msra.mxu1 %v360_v11  ;;  %v303_v29 = vld [vmem:[%s941_s7] sm:$0xff]  ;;  %v350_v31 = vld [vmem:[#allocation8 + $0x8] sm:$0xff]  ;;  %v349_v32 = vld [vmem:[#allocation8] sm:$0xff]  ;;  %s735_s7 = scalar_lea.hbm %s734_s21, 8 }
  0x32   : > { %333 = vmatpush.msra.mxu0 %v319_v8  ;;  %v351_v30 = vld [vmem:[#allocation8 + $0x10] sm:$0xff]  ;;  %p736_p1 = scmp.ne.s32.totalorder %s734_s21, %s735_s7  ;;  %p741_p10 = scmp.lt.s32.totalorder %s739_s26, %s735_s7 }
  0x33   : > { %370 = vmatpush.msra.mxu1 %v359_v13  ;;  %v627_v33 = vld [vmem:[%s1000_s2] ss:$0 sm:$0xff] }
  0x34   : > { %334 = vmatpush.msra.mxu0 %v318_v10  ;;  %v628_v37 = vld [vmem:[%s1002_s4] ss:$0 sm:$0xff]  ;;  %p737_p3 = pnand %p736_p1, %p915_p0  ;;  %p742_p12 = por %p741_p10, %p740_p9 }
  0x35   : > { %371 = vmatpush.msra.mxu1 %v358_v15 }
  0x36   : > { %335 = vmatpush.msra.mxu0 %v317_v12  ;;  %p738_p8 = pneg %p737_p3 }
  0x37   : > { %372 = vmatpush.msra.mxu1 %v357_v17 }
  0x38   : > { %336 = vmatpush.msra.mxu0 %v316_v14  ;;  %p743_p13 = pnand %p742_p12, %p738_p8 }
  0x39   : > { %373 = vmatpush.msra.mxu1 %v356_v19 }
  0x3a   : > { %337 = vmatpush.msra.mxu0 %v315_v16 }
  0x3b   : > { %374 = vmatpush.msra.mxu1 %v355_v21 }
  0x3c   : > { %338 = vmatpush.msra.mxu0 %v314_v18 }
  0x3d   : > { %375 = vmatpush.msra.mxu1 %v354_v23 }
  0x3e   : > { %339 = vmatpush.msra.mxu0 %v313_v20 }
  0x3f   : > { %376 = vmatpush.msra.mxu1 %v353_v25 }
  0x40   : > { %340 = vmatpush.msra.mxu0 %v312_v22 }
  0x41   : > { %377 = vmatpush.msra.mxu1 %v352_v27 }
  0x42   : > { %341 = vmatpush.msra.mxu0 %v311_v24 }
  0x43   : > { %378 = vmatpush.msra.mxu1 %v351_v30 }
  0x44   : > { %342 = vmatpush.msra.mxu0 %v310_v26 }
  0x45   : > { %379 = vmatpush.msra.mxu1 %v350_v31 }
  0x46   : > { %343 = vmatpush.msra.mxu0 %v309_v28 }
  0x47   : > { %344 = vmatmul.f32.vlgmr.msra.gmra.mxu0 %v303_v29  ;;  %380 = vmatpush.msra.mxu1 %v349_v32 }
  0xc4   : > { %v345_v34 = vpop.f32.mrf.mxu0 }
  0xc5   : > { %v346_v35 = vadd.f32 %v627_v33, %v345_v34 }
  0xc7   : > { %v348_v36 = vmax.f32 %v346_v35, 0.0 }
  0xc9   : > { %381 = vmatmul.f32.vlgmr.msra.gmra.mxu1 %v348_v36 }
 0x146   : > { %v382_v38 = vpop.f32.mrf.mxu1 }
 0x147   : > { %v405_v39 = vadd.f32 %v628_v37, %v382_v38 }
 0x149   : > { %406 = vst [vmem:[%s301_s12] sm:$0xff] %v405_v39 }
 0x14a   : > { %746 = shalt.err (!%p743_p13)
}
 0x14b   : > { %552 = dma.vmem_to_hbm [thread:$0]  (%p915_p0), %s421_s13, 128, %s423_s15, %s408_s24  }
 0x14c PF: > { %s434_s16 = sand.u32 1, %s785_s18   ;;  %p566_p2 = pnand %p530_p6, %p922_p5 }
 0x14d   : > { %s435_s8 = scalar_lea.sflag [#allocation5], %s434_s16 }
 0x14e   : > { %p567_p4 = pneg %p566_p2 }
 0x150   : > { %780 = dma.done.wait (%p567_p4), %s435_s8, 128  }
 0x151   : > { %782 = vsyncadd (%p567_p4), %s435_s8, 4294967168  ;;  %s22_s23 = sadd.s32 1, %s805_s23   ;;  %s1009_s18 = smov %s789_s19 }
 0x152   : > { %p19_p7 = scmp.ge.s32.totalorder %s22_s23, 4   ;;  %s1010_s19 = smov %s793_s20 }
 0x153   : > { %s1011_s20 = smov %s920_s28  ;;  %s1012_s21 = smov %s801_s22 }
 0x154   : > { %s1013_s22 = smov %s1015_s14  ;;  %21 = sbr.rel (!%p19_p7) target bundleno = 7 (0x7), region = 108 }
 0x159   :  { %441 = vsyncpa [#allocation4], 1 }
 0x15a   :  { %443 = vsyncpa [#allocation4 + $0x1], 1 }
 0x15b   :  { %444 = vsyncpa [#allocation7], 1 }
 0x15c   :  { %445 = vsyncpa [#allocation5], 1 }
 0x15d   :  { %447 = vsyncpa [#allocation5 + $0x1], 1 }

</bundles_post_ra>
